<compile_context>
chip_gen: v6e
topology: v6e:2x2x1
jax: 0.10.0
libtpu: 0.0.40
codegen_flags: <defaults>
</compile_context>

<pallas_src>
import functools

import jax
import jax.numpy as jnp
import numpy as np
from jax import lax
from jax.experimental import pallas as pl
from jax.experimental.pallas import tpu as pltpu


def mfcc_encoder_kernel(x_ref, gamma_ref, beta_ref,
                        w_i_ref, b_i_ref,
                        w_h_ref, b_hn_ref,
                        w_proj_ref, b_proj_ref,
                        out_ref, *, B, T, H, Z):
    # --- LayerNorm over the feature (n_mfccs) axis, eps = 1e-5 ---
    x = x_ref[...]                                         # (T*B, F), time-major
    mean = jnp.mean(x, axis=-1, keepdims=True)
    var = jnp.mean((x - mean) ** 2, axis=-1, keepdims=True)
    xn = (x - mean) * lax.rsqrt(var + 1e-5)
    xn = xn * gamma_ref[...] + beta_ref[...]               # (1, F) broadcast

    # --- input contributions to all 3 GRU gates: ONE matmul for every step.
    #     b_ir+b_hr and b_iz+b_hz are already folded into b_i (wrapper); b_hn
    #     stays separate because it must live inside r * (W_hn h + b_hn).
    gx = (jnp.dot(xn, w_i_ref[...], preferred_element_type=jnp.float32)
          + b_i_ref[...])                                  # (T*B, 3H)

    # Keep the (tiny) recurrent / projection weights resident in vregs.
    w_h = w_h_ref[...]                                     # (H, 3H)
    b_hn = b_hn_ref[...]                                   # (1, H)
    w_proj = w_proj_ref[...]                               # (H, Z)
    b_proj = b_proj_ref[...]                               # (1, Z)

    h = jnp.zeros((B, H), jnp.float32)                     # h_0 = 0 (PyTorch default)
    outs = []
    for t in range(T):                                     # fully unrolled (T static, small)
        gx_t = gx[t * B:(t + 1) * B, :]                    # static sublane slice (B, 3H)
        gh = jnp.dot(h, w_h, preferred_element_type=jnp.float32)  # (B, 3H), 1 MXU op/step
        r = jax.nn.sigmoid(gx_t[:, 0:H] + gh[:, 0:H])
        z = jax.nn.sigmoid(gx_t[:, H:2 * H] + gh[:, H:2 * H])
        n = jnp.tanh(gx_t[:, 2 * H:3 * H] + r * (gh[:, 2 * H:3 * H] + b_hn))
        h = (1.0 - z) * n + z * h
        outs.append(jnp.dot(h, w_proj, preferred_element_type=jnp.float32) + b_proj)

    # Single lane-dense store: (B, T*Z) with T*Z == 128 -> unmasked vst.
    out_ref[...] = jnp.concatenate(outs, axis=1)


def mfcc_encoder(mfccs, p):
    B, T, F = mfccs.shape
    H = p["w_hr"].shape[0]
    Z = p["w_proj"].shape[1]

    # Time-major flatten so timestep t is the contiguous row block [t*B, (t+1)*B).
    x_tm = jnp.transpose(mfccs, (1, 0, 2)).reshape(T * B, F)

    # Fuse gate weights / fold constant recurrent biases in the wrapper.
    w_i = jnp.concatenate([p["w_ir"], p["w_iz"], p["w_in"]], axis=1)        # (F, 3H)
    b_i = jnp.concatenate([p["b_ir"] + p["b_hr"],
                           p["b_iz"] + p["b_hz"],
                           p["b_in"]], axis=1)                              # (1, 3H)
    w_h = jnp.concatenate([p["w_hr"], p["w_hz"], p["w_hn"]], axis=1)        # (H, 3H)

    vmem = pl.BlockSpec(memory_space=pltpu.MemorySpace.VMEM)

    out_flat = pl.pallas_call(
        functools.partial(mfcc_encoder_kernel, B=B, T=T, H=H, Z=Z),
        out_shape=jax.ShapeDtypeStruct((B, T * Z), jnp.float32),
        in_specs=[vmem] * 9,
        out_specs=vmem,
    )(x_tm, p["gamma"], p["beta"], w_i, b_i, w_h, p["b_hn"],
      p["w_proj"], p["b_proj"])

    return out_flat.reshape(B, T, Z)


def ref_forward(mfccs, p):
    """Pure-JAX reference matching PyTorch LayerNorm -> GRU -> Linear."""
    mean = mfccs.mean(-1, keepdims=True)
    var = ((mfccs - mean) ** 2).mean(-1, keepdims=True)
    xn = (mfccs - mean) / jnp.sqrt(var + 1e-5) * p["gamma"][0] + p["beta"][0]
    B, T, F = mfccs.shape
    H = p["w_hr"].shape[0]
    h = jnp.zeros((B, H), jnp.float32)
    hs = []
    for t in range(T):
        xt = xn[:, t, :]
        r = jax.nn.sigmoid(xt @ p["w_ir"] + p["b_ir"] + h @ p["w_hr"] + p["b_hr"])
        z = jax.nn.sigmoid(xt @ p["w_iz"] + p["b_iz"] + h @ p["w_hz"] + p["b_hz"])
        n = jnp.tanh(xt @ p["w_in"] + p["b_in"] + r * (h @ p["w_hn"] + p["b_hn"]))
        h = (1.0 - z) * n + z * h
        hs.append(h)
    hs = jnp.stack(hs, axis=1)
    return hs @ p["w_proj"] + p["b_proj"]


def init_params(key, n_mfccs, hidden_size, z_dim):
    """Deterministic synthetic params with PyTorch-style uniform init ranges."""
    ks = jax.random.split(key, 16)
    kg = 1.0 / np.sqrt(hidden_size)   # GRU / Linear init bound
    u = lambda k, shape, bound: jax.random.uniform(
        k, shape, jnp.float32, minval=-bound, maxval=bound)
    H, F, Z = hidden_size, n_mfccs, z_dim
    return dict(
        gamma=jnp.ones((1, F), jnp.float32),
        beta=jnp.zeros((1, F), jnp.float32),
        w_ir=u(ks[0], (F, H), kg), w_iz=u(ks[1], (F, H), kg), w_in=u(ks[2], (F, H), kg),
        w_hr=u(ks[3], (H, H), kg), w_hz=u(ks[4], (H, H), kg), w_hn=u(ks[5], (H, H), kg),
        b_ir=u(ks[6], (1, H), kg), b_iz=u(ks[7], (1, H), kg), b_in=u(ks[8], (1, H), kg),
        b_hr=u(ks[9], (1, H), kg), b_hz=u(ks[10], (1, H), kg), b_hn=u(ks[11], (1, H), kg),
        w_proj=u(ks[12], (H, Z), kg), b_proj=u(ks[13], (1, Z), kg),
    )


if __name__ == "__main__":
    B, T = 2, 8               # batch, sequence length (num frames)
    n_mfccs = 30
    hidden_size = 32
    z_dim = 16                # T * z_dim = 128 -> lane-dense output slab

    key = jax.random.PRNGKey(0)
    k_x, k_p = jax.random.split(key)
    mfccs = jax.random.normal(k_x, (B, T, n_mfccs), jnp.float32)
    params = init_params(k_p, n_mfccs, hidden_size, z_dim)

    z = mfcc_encoder(mfccs, params)
    jax.block_until_ready(z)

    z_ref = ref_forward(mfccs, params)
    np.testing.assert_allclose(np.asarray(z), np.asarray(z_ref), atol=1e-4, rtol=1e-4)
    assert z.shape == (B, T, z_dim)

    print("KERNEL_OK")
</pallas_src>

<mosaic_0001>
module attributes {stable_mosaic.version = 11 : i64} {
  func.func @mfcc_encoder_kernel(%arg0: memref<16x30xf32, #tpu.memory_space<vmem>>, %arg1: memref<1x30xf32, #tpu.memory_space<vmem>>, %arg2: memref<1x30xf32, #tpu.memory_space<vmem>>, %arg3: memref<30x96xf32, #tpu.memory_space<vmem>>, %arg4: memref<1x96xf32, #tpu.memory_space<vmem>>, %arg5: memref<32x96xf32, #tpu.memory_space<vmem>>, %arg6: memref<1x32xf32, #tpu.memory_space<vmem>>, %arg7: memref<32x16xf32, #tpu.memory_space<vmem>>, %arg8: memref<1x16xf32, #tpu.memory_space<vmem>>, %arg9: memref<2x128xf32, #tpu.memory_space<vmem>>) attributes {dimension_semantics = [], scalar_prefetch = 0 : i64, scratch_operands = 0 : i64, tpu.core_type = #tpu.core_type<tc>} {
    %c0 = arith.constant 0 : index
    %c0_0 = arith.constant 0 : index
    %0 = vector.load %arg0[%c0, %c0_0] : memref<16x30xf32, #tpu.memory_space<vmem>>, vector<16x30xf32>
    %cst = arith.constant dense<0.000000e+00> : vector<16xf32>
    %1 = vector.multi_reduction <add>, %0, %cst [1] : vector<16x30xf32> to vector<16xf32>
    %2 = vector.shape_cast %1 : vector<16xf32> to vector<16x1xf32>
    %cst_1 = arith.constant 3.000000e+01 : f32
    %3 = vector.broadcast %cst_1 : f32 to vector<16x1xf32>
    %4 = arith.divf %2, %3 : vector<16x1xf32>
    %5 = vector.broadcast %4 : vector<16x1xf32> to vector<16x30xf32>
    %6 = arith.subf %0, %5 : vector<16x30xf32>
    %7 = arith.mulf %6, %6 : vector<16x30xf32>
    %cst_2 = arith.constant dense<0.000000e+00> : vector<16xf32>
    %8 = vector.multi_reduction <add>, %7, %cst_2 [1] : vector<16x30xf32> to vector<16xf32>
    %9 = vector.shape_cast %8 : vector<16xf32> to vector<16x1xf32>
    %cst_3 = arith.constant 3.000000e+01 : f32
    %10 = vector.broadcast %cst_3 : f32 to vector<16x1xf32>
    %11 = arith.divf %9, %10 : vector<16x1xf32>
    %12 = vector.broadcast %4 : vector<16x1xf32> to vector<16x30xf32>
    %13 = arith.subf %0, %12 : vector<16x30xf32>
    %cst_4 = arith.constant 9.99999974E-6 : f32
    %14 = vector.broadcast %cst_4 : f32 to vector<16x1xf32>
    %15 = arith.addf %11, %14 : vector<16x1xf32>
    %16 = math.rsqrt %15 : vector<16x1xf32>
    %17 = vector.broadcast %16 : vector<16x1xf32> to vector<16x30xf32>
    %18 = arith.mulf %13, %17 : vector<16x30xf32>
    %c0_5 = arith.constant 0 : index
    %c0_6 = arith.constant 0 : index
    %19 = vector.load %arg1[%c0_5, %c0_6] : memref<1x30xf32, #tpu.memory_space<vmem>>, vector<1x30xf32>
    %20 = vector.broadcast %19 : vector<1x30xf32> to vector<16x30xf32>
    %21 = arith.mulf %18, %20 : vector<16x30xf32>
    %c0_7 = arith.constant 0 : index
    %c0_8 = arith.constant 0 : index
    %22 = vector.load %arg2[%c0_7, %c0_8] : memref<1x30xf32, #tpu.memory_space<vmem>>, vector<1x30xf32>
    %23 = vector.broadcast %22 : vector<1x30xf32> to vector<16x30xf32>
    %24 = arith.addf %21, %23 : vector<16x30xf32>
    %c0_9 = arith.constant 0 : index
    %c0_10 = arith.constant 0 : index
    %25 = vector.load %arg3[%c0_9, %c0_10] : memref<30x96xf32, #tpu.memory_space<vmem>>, vector<30x96xf32>
    %cst_11 = arith.constant dense<0.000000e+00> : vector<16x96xf32>
    %26 = tpu.matmul %24, %25, %cst_11 {dimension_numbers = #tpu.dot_dimension_numbers<[1], [0], [0], [1], [0, 0, 1, 1], [], []>} : vector<16x30xf32>, vector<30x96xf32>, vector<16x96xf32> -> vector<16x96xf32>
    %c0_12 = arith.constant 0 : index
    %c0_13 = arith.constant 0 : index
    %27 = vector.load %arg4[%c0_12, %c0_13] : memref<1x96xf32, #tpu.memory_space<vmem>>, vector<1x96xf32>
    %28 = vector.broadcast %27 : vector<1x96xf32> to vector<16x96xf32>
    %29 = arith.addf %26, %28 : vector<16x96xf32>
    %c0_14 = arith.constant 0 : index
    %c0_15 = arith.constant 0 : index
    %30 = vector.load %arg5[%c0_14, %c0_15] : memref<32x96xf32, #tpu.memory_space<vmem>>, vector<32x96xf32>
    %c0_16 = arith.constant 0 : index
    %c0_17 = arith.constant 0 : index
    %31 = vector.load %arg6[%c0_16, %c0_17] : memref<1x32xf32, #tpu.memory_space<vmem>>, vector<1x32xf32>
    %c0_18 = arith.constant 0 : index
    %c0_19 = arith.constant 0 : index
    %32 = vector.load %arg7[%c0_18, %c0_19] : memref<32x16xf32, #tpu.memory_space<vmem>>, vector<32x16xf32>
    %c0_20 = arith.constant 0 : index
    %c0_21 = arith.constant 0 : index
    %33 = vector.load %arg8[%c0_20, %c0_21] : memref<1x16xf32, #tpu.memory_space<vmem>>, vector<1x16xf32>
    %cst_22 = arith.constant 0.000000e+00 : f32
    %34 = vector.broadcast %cst_22 : f32 to vector<2x32xf32>
    %35 = vector.extract_strided_slice %29 {offsets = [0, 0], sizes = [2, 96], strides = [1, 1]} : vector<16x96xf32> to vector<2x96xf32>
    %cst_23 = arith.constant dense<0.000000e+00> : vector<2x96xf32>
    %36 = tpu.matmul %34, %30, %cst_23 {dimension_numbers = #tpu.dot_dimension_numbers<[1], [0], [0], [1], [0, 0, 1, 1], [], []>} : vector<2x32xf32>, vector<32x96xf32>, vector<2x96xf32> -> vector<2x96xf32>
    %37 = vector.extract_strided_slice %35 {offsets = [0, 0], sizes = [2, 32], strides = [1, 1]} : vector<2x96xf32> to vector<2x32xf32>
    %38 = vector.extract_strided_slice %36 {offsets = [0, 0], sizes = [2, 32], strides = [1, 1]} : vector<2x96xf32> to vector<2x32xf32>
    %39 = arith.addf %37, %38 : vector<2x32xf32>
    %40 = arith.negf %39 : vector<2x32xf32>
    %41 = math.exp %40 : vector<2x32xf32>
    %cst_24 = arith.constant 1.000000e+00 : f32
    %42 = vector.broadcast %cst_24 : f32 to vector<2x32xf32>
    %43 = arith.addf %42, %41 : vector<2x32xf32>
    %44 = arith.divf %42, %43 : vector<2x32xf32>
    %45 = vector.extract_strided_slice %35 {offsets = [0, 32], sizes = [2, 32], strides = [1, 1]} : vector<2x96xf32> to vector<2x32xf32>
    %46 = vector.extract_strided_slice %36 {offsets = [0, 32], sizes = [2, 32], strides = [1, 1]} : vector<2x96xf32> to vector<2x32xf32>
    %47 = arith.addf %45, %46 : vector<2x32xf32>
    %48 = arith.negf %47 : vector<2x32xf32>
    %49 = math.exp %48 : vector<2x32xf32>
    %cst_25 = arith.constant 1.000000e+00 : f32
    %50 = vector.broadcast %cst_25 : f32 to vector<2x32xf32>
    %51 = arith.addf %50, %49 : vector<2x32xf32>
    %52 = arith.divf %50, %51 : vector<2x32xf32>
    %53 = vector.extract_strided_slice %35 {offsets = [0, 64], sizes = [2, 32], strides = [1, 1]} : vector<2x96xf32> to vector<2x32xf32>
    %54 = vector.extract_strided_slice %36 {offsets = [0, 64], sizes = [2, 32], strides = [1, 1]} : vector<2x96xf32> to vector<2x32xf32>
    %55 = vector.broadcast %31 : vector<1x32xf32> to vector<2x32xf32>
    %56 = arith.addf %54, %55 : vector<2x32xf32>
    %57 = arith.mulf %44, %56 : vector<2x32xf32>
    %58 = arith.addf %53, %57 : vector<2x32xf32>
    %59 = math.tanh %58 : vector<2x32xf32>
    %cst_26 = arith.constant 1.000000e+00 : f32
    %60 = vector.broadcast %cst_26 : f32 to vector<2x32xf32>
    %61 = arith.subf %60, %52 : vector<2x32xf32>
    %62 = arith.mulf %61, %59 : vector<2x32xf32>
    %63 = arith.mulf %52, %34 : vector<2x32xf32>
    %64 = arith.addf %62, %63 : vector<2x32xf32>
    %cst_27 = arith.constant dense<0.000000e+00> : vector<2x16xf32>
    %65 = tpu.matmul %64, %32, %cst_27 {dimension_numbers = #tpu.dot_dimension_numbers<[1], [0], [0], [1], [0, 0, 1, 1], [], []>} : vector<2x32xf32>, vector<32x16xf32>, vector<2x16xf32> -> vector<2x16xf32>
    %66 = vector.broadcast %33 : vector<1x16xf32> to vector<2x16xf32>
    %67 = arith.addf %65, %66 : vector<2x16xf32>
    %68 = vector.extract_strided_slice %29 {offsets = [2, 0], sizes = [2, 96], strides = [1, 1]} : vector<16x96xf32> to vector<2x96xf32>
    %cst_28 = arith.constant dense<0.000000e+00> : vector<2x96xf32>
    %69 = tpu.matmul %64, %30, %cst_28 {dimension_numbers = #tpu.dot_dimension_numbers<[1], [0], [0], [1], [0, 0, 1, 1], [], []>} : vector<2x32xf32>, vector<32x96xf32>, vector<2x96xf32> -> vector<2x96xf32>
    %70 = vector.extract_strided_slice %68 {offsets = [0, 0], sizes = [2, 32], strides = [1, 1]} : vector<2x96xf32> to vector<2x32xf32>
    %71 = vector.extract_strided_slice %69 {offsets = [0, 0], sizes = [2, 32], strides = [1, 1]} : vector<2x96xf32> to vector<2x32xf32>
    %72 = arith.addf %70, %71 : vector<2x32xf32>
    %73 = arith.negf %72 : vector<2x32xf32>
    %74 = math.exp %73 : vector<2x32xf32>
    %cst_29 = arith.constant 1.000000e+00 : f32
    %75 = vector.broadcast %cst_29 : f32 to vector<2x32xf32>
    %76 = arith.addf %75, %74 : vector<2x32xf32>
    %77 = arith.divf %75, %76 : vector<2x32xf32>
    %78 = vector.extract_strided_slice %68 {offsets = [0, 32], sizes = [2, 32], strides = [1, 1]} : vector<2x96xf32> to vector<2x32xf32>
    %79 = vector.extract_strided_slice %69 {offsets = [0, 32], sizes = [2, 32], strides = [1, 1]} : vector<2x96xf32> to vector<2x32xf32>
    %80 = arith.addf %78, %79 : vector<2x32xf32>
    %81 = arith.negf %80 : vector<2x32xf32>
    %82 = math.exp %81 : vector<2x32xf32>
    %cst_30 = arith.constant 1.000000e+00 : f32
    %83 = vector.broadcast %cst_30 : f32 to vector<2x32xf32>
    %84 = arith.addf %83, %82 : vector<2x32xf32>
    %85 = arith.divf %83, %84 : vector<2x32xf32>
    %86 = vector.extract_strided_slice %68 {offsets = [0, 64], sizes = [2, 32], strides = [1, 1]} : vector<2x96xf32> to vector<2x32xf32>
    %87 = vector.extract_strided_slice %69 {offsets = [0, 64], sizes = [2, 32], strides = [1, 1]} : vector<2x96xf32> to vector<2x32xf32>
    %88 = vector.broadcast %31 : vector<1x32xf32> to vector<2x32xf32>
    %89 = arith.addf %87, %88 : vector<2x32xf32>
    %90 = arith.mulf %77, %89 : vector<2x32xf32>
    %91 = arith.addf %86, %90 : vector<2x32xf32>
    %92 = math.tanh %91 : vector<2x32xf32>
    %cst_31 = arith.constant 1.000000e+00 : f32
    %93 = vector.broadcast %cst_31 : f32 to vector<2x32xf32>
    %94 = arith.subf %93, %85 : vector<2x32xf32>
    %95 = arith.mulf %94, %92 : vector<2x32xf32>
    %96 = arith.mulf %85, %64 : vector<2x32xf32>
    %97 = arith.addf %95, %96 : vector<2x32xf32>
    %cst_32 = arith.constant dense<0.000000e+00> : vector<2x16xf32>
    %98 = tpu.matmul %97, %32, %cst_32 {dimension_numbers = #tpu.dot_dimension_numbers<[1], [0], [0], [1], [0, 0, 1, 1], [], []>} : vector<2x32xf32>, vector<32x16xf32>, vector<2x16xf32> -> vector<2x16xf32>
    %99 = vector.broadcast %33 : vector<1x16xf32> to vector<2x16xf32>
    %100 = arith.addf %98, %99 : vector<2x16xf32>
    %101 = vector.extract_strided_slice %29 {offsets = [4, 0], sizes = [2, 96], strides = [1, 1]} : vector<16x96xf32> to vector<2x96xf32>
    %cst_33 = arith.constant dense<0.000000e+00> : vector<2x96xf32>
    %102 = tpu.matmul %97, %30, %cst_33 {dimension_numbers = #tpu.dot_dimension_numbers<[1], [0], [0], [1], [0, 0, 1, 1], [], []>} : vector<2x32xf32>, vector<32x96xf32>, vector<2x96xf32> -> vector<2x96xf32>
    %103 = vector.extract_strided_slice %101 {offsets = [0, 0], sizes = [2, 32], strides = [1, 1]} : vector<2x96xf32> to vector<2x32xf32>
    %104 = vector.extract_strided_slice %102 {offsets = [0, 0], sizes = [2, 32], strides = [1, 1]} : vector<2x96xf32> to vector<2x32xf32>
    %105 = arith.addf %103, %104 : vector<2x32xf32>
    %106 = arith.negf %105 : vector<2x32xf32>
    %107 = math.exp %106 : vector<2x32xf32>
    %cst_34 = arith.constant 1.000000e+00 : f32
    %108 = vector.broadcast %cst_34 : f32 to vector<2x32xf32>
    %109 = arith.addf %108, %107 : vector<2x32xf32>
    %110 = arith.divf %108, %109 : vector<2x32xf32>
    %111 = vector.extract_strided_slice %101 {offsets = [0, 32], sizes = [2, 32], strides = [1, 1]} : vector<2x96xf32> to vector<2x32xf32>
    %112 = vector.extract_strided_slice %102 {offsets = [0, 32], sizes = [2, 32], strides = [1, 1]} : vector<2x96xf32> to vector<2x32xf32>
    %113 = arith.addf %111, %112 : vector<2x32xf32>
    %114 = arith.negf %113 : vector<2x32xf32>
    %115 = math.exp %114 : vector<2x32xf32>
    %cst_35 = arith.constant 1.000000e+00 : f32
    %116 = vector.broadcast %cst_35 : f32 to vector<2x32xf32>
    %117 = arith.addf %116, %115 : vector<2x32xf32>
    %118 = arith.divf %116, %117 : vector<2x32xf32>
    %119 = vector.extract_strided_slice %101 {offsets = [0, 64], sizes = [2, 32], strides = [1, 1]} : vector<2x96xf32> to vector<2x32xf32>
    %120 = vector.extract_strided_slice %102 {offsets = [0, 64], sizes = [2, 32], strides = [1, 1]} : vector<2x96xf32> to vector<2x32xf32>
    %121 = vector.broadcast %31 : vector<1x32xf32> to vector<2x32xf32>
    %122 = arith.addf %120, %121 : vector<2x32xf32>
    %123 = arith.mulf %110, %122 : vector<2x32xf32>
    %124 = arith.addf %119, %123 : vector<2x32xf32>
    %125 = math.tanh %124 : vector<2x32xf32>
    %cst_36 = arith.constant 1.000000e+00 : f32
    %126 = vector.broadcast %cst_36 : f32 to vector<2x32xf32>
    %127 = arith.subf %126, %118 : vector<2x32xf32>
    %128 = arith.mulf %127, %125 : vector<2x32xf32>
    %129 = arith.mulf %118, %97 : vector<2x32xf32>
    %130 = arith.addf %128, %129 : vector<2x32xf32>
    %cst_37 = arith.constant dense<0.000000e+00> : vector<2x16xf32>
    %131 = tpu.matmul %130, %32, %cst_37 {dimension_numbers = #tpu.dot_dimension_numbers<[1], [0], [0], [1], [0, 0, 1, 1], [], []>} : vector<2x32xf32>, vector<32x16xf32>, vector<2x16xf32> -> vector<2x16xf32>
    %132 = vector.broadcast %33 : vector<1x16xf32> to vector<2x16xf32>
    %133 = arith.addf %131, %132 : vector<2x16xf32>
    %134 = vector.extract_strided_slice %29 {offsets = [6, 0], sizes = [2, 96], strides = [1, 1]} : vector<16x96xf32> to vector<2x96xf32>
    %cst_38 = arith.constant dense<0.000000e+00> : vector<2x96xf32>
    %135 = tpu.matmul %130, %30, %cst_38 {dimension_numbers = #tpu.dot_dimension_numbers<[1], [0], [0], [1], [0, 0, 1, 1], [], []>} : vector<2x32xf32>, vector<32x96xf32>, vector<2x96xf32> -> vector<2x96xf32>
    %136 = vector.extract_strided_slice %134 {offsets = [0, 0], sizes = [2, 32], strides = [1, 1]} : vector<2x96xf32> to vector<2x32xf32>
    %137 = vector.extract_strided_slice %135 {offsets = [0, 0], sizes = [2, 32], strides = [1, 1]} : vector<2x96xf32> to vector<2x32xf32>
    %138 = arith.addf %136, %137 : vector<2x32xf32>
    %139 = arith.negf %138 : vector<2x32xf32>
    %140 = math.exp %139 : vector<2x32xf32>
    %cst_39 = arith.constant 1.000000e+00 : f32
    %141 = vector.broadcast %cst_39 : f32 to vector<2x32xf32>
    %142 = arith.addf %141, %140 : vector<2x32xf32>
    %143 = arith.divf %141, %142 : vector<2x32xf32>
    %144 = vector.extract_strided_slice %134 {offsets = [0, 32], sizes = [2, 32], strides = [1, 1]} : vector<2x96xf32> to vector<2x32xf32>
    %145 = vector.extract_strided_slice %135 {offsets = [0, 32], sizes = [2, 32], strides = [1, 1]} : vector<2x96xf32> to vector<2x32xf32>
    %146 = arith.addf %144, %145 : vector<2x32xf32>
    %147 = arith.negf %146 : vector<2x32xf32>
    %148 = math.exp %147 : vector<2x32xf32>
    %cst_40 = arith.constant 1.000000e+00 : f32
    %149 = vector.broadcast %cst_40 : f32 to vector<2x32xf32>
    %150 = arith.addf %149, %148 : vector<2x32xf32>
    %151 = arith.divf %149, %150 : vector<2x32xf32>
    %152 = vector.extract_strided_slice %134 {offsets = [0, 64], sizes = [2, 32], strides = [1, 1]} : vector<2x96xf32> to vector<2x32xf32>
    %153 = vector.extract_strided_slice %135 {offsets = [0, 64], sizes = [2, 32], strides = [1, 1]} : vector<2x96xf32> to vector<2x32xf32>
    %154 = vector.broadcast %31 : vector<1x32xf32> to vector<2x32xf32>
    %155 = arith.addf %153, %154 : vector<2x32xf32>
    %156 = arith.mulf %143, %155 : vector<2x32xf32>
    %157 = arith.addf %152, %156 : vector<2x32xf32>
    %158 = math.tanh %157 : vector<2x32xf32>
    %cst_41 = arith.constant 1.000000e+00 : f32
    %159 = vector.broadcast %cst_41 : f32 to vector<2x32xf32>
    %160 = arith.subf %159, %151 : vector<2x32xf32>
    %161 = arith.mulf %160, %158 : vector<2x32xf32>
    %162 = arith.mulf %151, %130 : vector<2x32xf32>
    %163 = arith.addf %161, %162 : vector<2x32xf32>
    %cst_42 = arith.constant dense<0.000000e+00> : vector<2x16xf32>
    %164 = tpu.matmul %163, %32, %cst_42 {dimension_numbers = #tpu.dot_dimension_numbers<[1], [0], [0], [1], [0, 0, 1, 1], [], []>} : vector<2x32xf32>, vector<32x16xf32>, vector<2x16xf32> -> vector<2x16xf32>
    %165 = vector.broadcast %33 : vector<1x16xf32> to vector<2x16xf32>
    %166 = arith.addf %164, %165 : vector<2x16xf32>
    %167 = vector.extract_strided_slice %29 {offsets = [8, 0], sizes = [2, 96], strides = [1, 1]} : vector<16x96xf32> to vector<2x96xf32>
    %cst_43 = arith.constant dense<0.000000e+00> : vector<2x96xf32>
    %168 = tpu.matmul %163, %30, %cst_43 {dimension_numbers = #tpu.dot_dimension_numbers<[1], [0], [0], [1], [0, 0, 1, 1], [], []>} : vector<2x32xf32>, vector<32x96xf32>, vector<2x96xf32> -> vector<2x96xf32>
    %169 = vector.extract_strided_slice %167 {offsets = [0, 0], sizes = [2, 32], strides = [1, 1]} : vector<2x96xf32> to vector<2x32xf32>
    %170 = vector.extract_strided_slice %168 {offsets = [0, 0], sizes = [2, 32], strides = [1, 1]} : vector<2x96xf32> to vector<2x32xf32>
    %171 = arith.addf %169, %170 : vector<2x32xf32>
    %172 = arith.negf %171 : vector<2x32xf32>
    %173 = math.exp %172 : vector<2x32xf32>
    %cst_44 = arith.constant 1.000000e+00 : f32
    %174 = vector.broadcast %cst_44 : f32 to vector<2x32xf32>
    %175 = arith.addf %174, %173 : vector<2x32xf32>
    %176 = arith.divf %174, %175 : vector<2x32xf32>
    %177 = vector.extract_strided_slice %167 {offsets = [0, 32], sizes = [2, 32], strides = [1, 1]} : vector<2x96xf32> to vector<2x32xf32>
    %178 = vector.extract_strided_slice %168 {offsets = [0, 32], sizes = [2, 32], strides = [1, 1]} : vector<2x96xf32> to vector<2x32xf32>
    %179 = arith.addf %177, %178 : vector<2x32xf32>
    %180 = arith.negf %179 : vector<2x32xf32>
    %181 = math.exp %180 : vector<2x32xf32>
    %cst_45 = arith.constant 1.000000e+00 : f32
    %182 = vector.broadcast %cst_45 : f32 to vector<2x32xf32>
    %183 = arith.addf %182, %181 : vector<2x32xf32>
    %184 = arith.divf %182, %183 : vector<2x32xf32>
    %185 = vector.extract_strided_slice %167 {offsets = [0, 64], sizes = [2, 32], strides = [1, 1]} : vector<2x96xf32> to vector<2x32xf32>
    %186 = vector.extract_strided_slice %168 {offsets = [0, 64], sizes = [2, 32], strides = [1, 1]} : vector<2x96xf32> to vector<2x32xf32>
    %187 = vector.broadcast %31 : vector<1x32xf32> to vector<2x32xf32>
    %188 = arith.addf %186, %187 : vector<2x32xf32>
    %189 = arith.mulf %176, %188 : vector<2x32xf32>
    %190 = arith.addf %185, %189 : vector<2x32xf32>
    %191 = math.tanh %190 : vector<2x32xf32>
    %cst_46 = arith.constant 1.000000e+00 : f32
    %192 = vector.broadcast %cst_46 : f32 to vector<2x32xf32>
    %193 = arith.subf %192, %184 : vector<2x32xf32>
    %194 = arith.mulf %193, %191 : vector<2x32xf32>
    %195 = arith.mulf %184, %163 : vector<2x32xf32>
    %196 = arith.addf %194, %195 : vector<2x32xf32>
    %cst_47 = arith.constant dense<0.000000e+00> : vector<2x16xf32>
    %197 = tpu.matmul %196, %32, %cst_47 {dimension_numbers = #tpu.dot_dimension_numbers<[1], [0], [0], [1], [0, 0, 1, 1], [], []>} : vector<2x32xf32>, vector<32x16xf32>, vector<2x16xf32> -> vector<2x16xf32>
    %198 = vector.broadcast %33 : vector<1x16xf32> to vector<2x16xf32>
    %199 = arith.addf %197, %198 : vector<2x16xf32>
    %200 = vector.extract_strided_slice %29 {offsets = [10, 0], sizes = [2, 96], strides = [1, 1]} : vector<16x96xf32> to vector<2x96xf32>
    %cst_48 = arith.constant dense<0.000000e+00> : vector<2x96xf32>
    %201 = tpu.matmul %196, %30, %cst_48 {dimension_numbers = #tpu.dot_dimension_numbers<[1], [0], [0], [1], [0, 0, 1, 1], [], []>} : vector<2x32xf32>, vector<32x96xf32>, vector<2x96xf32> -> vector<2x96xf32>
    %202 = vector.extract_strided_slice %200 {offsets = [0, 0], sizes = [2, 32], strides = [1, 1]} : vector<2x96xf32> to vector<2x32xf32>
    %203 = vector.extract_strided_slice %201 {offsets = [0, 0], sizes = [2, 32], strides = [1, 1]} : vector<2x96xf32> to vector<2x32xf32>
    %204 = arith.addf %202, %203 : vector<2x32xf32>
    %205 = arith.negf %204 : vector<2x32xf32>
    %206 = math.exp %205 : vector<2x32xf32>
    %cst_49 = arith.constant 1.000000e+00 : f32
    %207 = vector.broadcast %cst_49 : f32 to vector<2x32xf32>
    %208 = arith.addf %207, %206 : vector<2x32xf32>
    %209 = arith.divf %207, %208 : vector<2x32xf32>
    %210 = vector.extract_strided_slice %200 {offsets = [0, 32], sizes = [2, 32], strides = [1, 1]} : vector<2x96xf32> to vector<2x32xf32>
    %211 = vector.extract_strided_slice %201 {offsets = [0, 32], sizes = [2, 32], strides = [1, 1]} : vector<2x96xf32> to vector<2x32xf32>
    %212 = arith.addf %210, %211 : vector<2x32xf32>
    %213 = arith.negf %212 : vector<2x32xf32>
    %214 = math.exp %213 : vector<2x32xf32>
    %cst_50 = arith.constant 1.000000e+00 : f32
    %215 = vector.broadcast %cst_50 : f32 to vector<2x32xf32>
    %216 = arith.addf %215, %214 : vector<2x32xf32>
    %217 = arith.divf %215, %216 : vector<2x32xf32>
    %218 = vector.extract_strided_slice %200 {offsets = [0, 64], sizes = [2, 32], strides = [1, 1]} : vector<2x96xf32> to vector<2x32xf32>
    %219 = vector.extract_strided_slice %201 {offsets = [0, 64], sizes = [2, 32], strides = [1, 1]} : vector<2x96xf32> to vector<2x32xf32>
    %220 = vector.broadcast %31 : vector<1x32xf32> to vector<2x32xf32>
    %221 = arith.addf %219, %220 : vector<2x32xf32>
    %222 = arith.mulf %209, %221 : vector<2x32xf32>
    %223 = arith.addf %218, %222 : vector<2x32xf32>
    %224 = math.tanh %223 : vector<2x32xf32>
    %cst_51 = arith.constant 1.000000e+00 : f32
    %225 = vector.broadcast %cst_51 : f32 to vector<2x32xf32>
    %226 = arith.subf %225, %217 : vector<2x32xf32>
    %227 = arith.mulf %226, %224 : vector<2x32xf32>
    %228 = arith.mulf %217, %196 : vector<2x32xf32>
    %229 = arith.addf %227, %228 : vector<2x32xf32>
    %cst_52 = arith.constant dense<0.000000e+00> : vector<2x16xf32>
    %230 = tpu.matmul %229, %32, %cst_52 {dimension_numbers = #tpu.dot_dimension_numbers<[1], [0], [0], [1], [0, 0, 1, 1], [], []>} : vector<2x32xf32>, vector<32x16xf32>, vector<2x16xf32> -> vector<2x16xf32>
    %231 = vector.broadcast %33 : vector<1x16xf32> to vector<2x16xf32>
    %232 = arith.addf %230, %231 : vector<2x16xf32>
    %233 = vector.extract_strided_slice %29 {offsets = [12, 0], sizes = [2, 96], strides = [1, 1]} : vector<16x96xf32> to vector<2x96xf32>
    %cst_53 = arith.constant dense<0.000000e+00> : vector<2x96xf32>
    %234 = tpu.matmul %229, %30, %cst_53 {dimension_numbers = #tpu.dot_dimension_numbers<[1], [0], [0], [1], [0, 0, 1, 1], [], []>} : vector<2x32xf32>, vector<32x96xf32>, vector<2x96xf32> -> vector<2x96xf32>
    %235 = vector.extract_strided_slice %233 {offsets = [0, 0], sizes = [2, 32], strides = [1, 1]} : vector<2x96xf32> to vector<2x32xf32>
    %236 = vector.extract_strided_slice %234 {offsets = [0, 0], sizes = [2, 32], strides = [1, 1]} : vector<2x96xf32> to vector<2x32xf32>
    %237 = arith.addf %235, %236 : vector<2x32xf32>
    %238 = arith.negf %237 : vector<2x32xf32>
    %239 = math.exp %238 : vector<2x32xf32>
    %cst_54 = arith.constant 1.000000e+00 : f32
    %240 = vector.broadcast %cst_54 : f32 to vector<2x32xf32>
    %241 = arith.addf %240, %239 : vector<2x32xf32>
    %242 = arith.divf %240, %241 : vector<2x32xf32>
    %243 = vector.extract_strided_slice %233 {offsets = [0, 32], sizes = [2, 32], strides = [1, 1]} : vector<2x96xf32> to vector<2x32xf32>
    %244 = vector.extract_strided_slice %234 {offsets = [0, 32], sizes = [2, 32], strides = [1, 1]} : vector<2x96xf32> to vector<2x32xf32>
    %245 = arith.addf %243, %244 : vector<2x32xf32>
    %246 = arith.negf %245 : vector<2x32xf32>
    %247 = math.exp %246 : vector<2x32xf32>
    %cst_55 = arith.constant 1.000000e+00 : f32
    %248 = vector.broadcast %cst_55 : f32 to vector<2x32xf32>
    %249 = arith.addf %248, %247 : vector<2x32xf32>
    %250 = arith.divf %248, %249 : vector<2x32xf32>
    %251 = vector.extract_strided_slice %233 {offsets = [0, 64], sizes = [2, 32], strides = [1, 1]} : vector<2x96xf32> to vector<2x32xf32>
    %252 = vector.extract_strided_slice %234 {offsets = [0, 64], sizes = [2, 32], strides = [1, 1]} : vector<2x96xf32> to vector<2x32xf32>
    %253 = vector.broadcast %31 : vector<1x32xf32> to vector<2x32xf32>
    %254 = arith.addf %252, %253 : vector<2x32xf32>
    %255 = arith.mulf %242, %254 : vector<2x32xf32>
    %256 = arith.addf %251, %255 : vector<2x32xf32>
    %257 = math.tanh %256 : vector<2x32xf32>
    %cst_56 = arith.constant 1.000000e+00 : f32
    %258 = vector.broadcast %cst_56 : f32 to vector<2x32xf32>
    %259 = arith.subf %258, %250 : vector<2x32xf32>
    %260 = arith.mulf %259, %257 : vector<2x32xf32>
    %261 = arith.mulf %250, %229 : vector<2x32xf32>
    %262 = arith.addf %260, %261 : vector<2x32xf32>
    %cst_57 = arith.constant dense<0.000000e+00> : vector<2x16xf32>
    %263 = tpu.matmul %262, %32, %cst_57 {dimension_numbers = #tpu.dot_dimension_numbers<[1], [0], [0], [1], [0, 0, 1, 1], [], []>} : vector<2x32xf32>, vector<32x16xf32>, vector<2x16xf32> -> vector<2x16xf32>
    %264 = vector.broadcast %33 : vector<1x16xf32> to vector<2x16xf32>
    %265 = arith.addf %263, %264 : vector<2x16xf32>
    %266 = vector.extract_strided_slice %29 {offsets = [14, 0], sizes = [2, 96], strides = [1, 1]} : vector<16x96xf32> to vector<2x96xf32>
    %cst_58 = arith.constant dense<0.000000e+00> : vector<2x96xf32>
    %267 = tpu.matmul %262, %30, %cst_58 {dimension_numbers = #tpu.dot_dimension_numbers<[1], [0], [0], [1], [0, 0, 1, 1], [], []>} : vector<2x32xf32>, vector<32x96xf32>, vector<2x96xf32> -> vector<2x96xf32>
    %268 = vector.extract_strided_slice %266 {offsets = [0, 0], sizes = [2, 32], strides = [1, 1]} : vector<2x96xf32> to vector<2x32xf32>
    %269 = vector.extract_strided_slice %267 {offsets = [0, 0], sizes = [2, 32], strides = [1, 1]} : vector<2x96xf32> to vector<2x32xf32>
    %270 = arith.addf %268, %269 : vector<2x32xf32>
    %271 = arith.negf %270 : vector<2x32xf32>
    %272 = math.exp %271 : vector<2x32xf32>
    %cst_59 = arith.constant 1.000000e+00 : f32
    %273 = vector.broadcast %cst_59 : f32 to vector<2x32xf32>
    %274 = arith.addf %273, %272 : vector<2x32xf32>
    %275 = arith.divf %273, %274 : vector<2x32xf32>
    %276 = vector.extract_strided_slice %266 {offsets = [0, 32], sizes = [2, 32], strides = [1, 1]} : vector<2x96xf32> to vector<2x32xf32>
    %277 = vector.extract_strided_slice %267 {offsets = [0, 32], sizes = [2, 32], strides = [1, 1]} : vector<2x96xf32> to vector<2x32xf32>
    %278 = arith.addf %276, %277 : vector<2x32xf32>
    %279 = arith.negf %278 : vector<2x32xf32>
    %280 = math.exp %279 : vector<2x32xf32>
    %cst_60 = arith.constant 1.000000e+00 : f32
    %281 = vector.broadcast %cst_60 : f32 to vector<2x32xf32>
    %282 = arith.addf %281, %280 : vector<2x32xf32>
    %283 = arith.divf %281, %282 : vector<2x32xf32>
    %284 = vector.extract_strided_slice %266 {offsets = [0, 64], sizes = [2, 32], strides = [1, 1]} : vector<2x96xf32> to vector<2x32xf32>
    %285 = vector.extract_strided_slice %267 {offsets = [0, 64], sizes = [2, 32], strides = [1, 1]} : vector<2x96xf32> to vector<2x32xf32>
    %286 = vector.broadcast %31 : vector<1x32xf32> to vector<2x32xf32>
    %287 = arith.addf %285, %286 : vector<2x32xf32>
    %288 = arith.mulf %275, %287 : vector<2x32xf32>
    %289 = arith.addf %284, %288 : vector<2x32xf32>
    %290 = math.tanh %289 : vector<2x32xf32>
    %cst_61 = arith.constant 1.000000e+00 : f32
    %291 = vector.broadcast %cst_61 : f32 to vector<2x32xf32>
    %292 = arith.subf %291, %283 : vector<2x32xf32>
    %293 = arith.mulf %292, %290 : vector<2x32xf32>
    %294 = arith.mulf %283, %262 : vector<2x32xf32>
    %295 = arith.addf %293, %294 : vector<2x32xf32>
    %cst_62 = arith.constant dense<0.000000e+00> : vector<2x16xf32>
    %296 = tpu.matmul %295, %32, %cst_62 {dimension_numbers = #tpu.dot_dimension_numbers<[1], [0], [0], [1], [0, 0, 1, 1], [], []>} : vector<2x32xf32>, vector<32x16xf32>, vector<2x16xf32> -> vector<2x16xf32>
    %297 = vector.broadcast %33 : vector<1x16xf32> to vector<2x16xf32>
    %298 = arith.addf %296, %297 : vector<2x16xf32>
    %299 = tpu.concatenate %67, %100, %133, %166, %199, %232, %265, %298 in 1 : vector<2x16xf32>, vector<2x16xf32>, vector<2x16xf32>, vector<2x16xf32>, vector<2x16xf32>, vector<2x16xf32>, vector<2x16xf32>, vector<2x16xf32> -> vector<2x128xf32>
    %c0_63 = arith.constant 0 : index
    %c0_64 = arith.constant 0 : index
    %300 = vector.load %arg9[%c0_63, %c0_64] : memref<2x128xf32, #tpu.memory_space<vmem>>, vector<2x128xf32>
    tpu.vector_store %arg9[%c0_63, %c0_64], %299 {strides = array<i32>} : memref<2x128xf32, #tpu.memory_space<vmem>>, vector<2x128xf32>,
    return
  }
}

</mosaic_0001>

<bundles_post_ra>
// kernel: tpu_custom_call.1
= control target key start
LH: loop header
LB: loop body
LE: loop exit
PB: predicated region body
PF: predicated region fallthrough
CT: control target
= control target key end

     0   :  { %14 = vsyncpa [#allocation3], 0  ;;  %s2504_s0 = inlined_call_operand.vmem [shape: f32[16,30], index: 0, kind: input, shape index: {}]   ;;  %s2505_s1 = inlined_call_operand.vmem [shape: f32[1,30], index: 1, kind: input, shape index: {}]   ;;  %s2506_s2 = inlined_call_operand.vmem [shape: f32[1,30], index: 2, kind: input, shape index: {}]   ;;  %s2507_s3 = inlined_call_operand.vmem [shape: f32[30,96], index: 3, kind: input, shape index: {}]   ;;  %s2508_s4 = inlined_call_operand.vmem [shape: f32[1,96], index: 4, kind: input, shape index: {}]   ;;  %s2509_s5 = inlined_call_operand.hbm [shape: f32[32,96], index: 5, kind: input, shape index: {}]   ;;  %s2510_s6 = inlined_call_operand.vmem [shape: f32[1,32], index: 6, kind: input, shape index: {}]   ;;  %s2511_s7 = inlined_call_operand.vmem [shape: f32[32,16], index: 7, kind: input, shape index: {}]   ;;  %s2512_s8 = inlined_call_operand.vmem [shape: f32[1,16], index: 8, kind: input, shape index: {}]   ;;  %s2513_s9 = inlined_call_operand.hbm [shape: f32[2,128], index: 9, kind: output, shape index: {}]  }
   0x1   :  { %15 = vsyncpa [#allocation4], 0  ;;  %s2108_s30 = smov [#allocation2]  }
   0x2   :  { %s31_s10 = sshll.u32 %s2108_s30, 4  ;;  %s32_s10 = int_to_ptr.vmem [resolvable:$true] %s31_s10 }
   0x3   :  { %s2072_s11 = scalar_lea.vmem %s32_s10, 512  ;;  %p2077_p1 = scmp.lt.s32.totalorder %s32_s10, %s32_s10 }
   0x4   :  { %p2073_p0 = scmp.ne.s32.totalorder %s32_s10, %s2072_s11  ;;  %p2078_p2 = scmp.lt.s32.totalorder %s2072_s11, %s2072_s11 }
   0x6   :  { %p2079_p3 = por %p2078_p2, %p2077_p1 }
   0x8   :  { %p2080_p4 = pnand %p2079_p3, %p2073_p0 }
   0xa   :  { %2083 = shalt.err (!%p2080_p4)
}
   0xb   :  { %s2109_s12 = smov 128   ;;  %s2110_s13 = smov 8  }
   0xc   :  { %37 = dma.hbm_to_vmem [thread:$0]  %s2509_s5, 512, %s32_s10, [#allocation3], %s2109_s12, %s2109_s12, %s2110_s13  }
   0xd   :  { %2104 = dma.done.wait [#allocation3], 512  }
   0xe   :  { %2105 = vsyncadd [#allocation3], 4294966784  ;;  %vm49_vm0 = vcmask 244736   ;;  %v47_v0 = vld [vmem:[%s2504_s0] sm:$0xff]  ;;  %v48_v1 = vld [vmem:[%s2504_s0 + $0x8] sm:$0xff]  ;;  %v2111_v5 = vmov 0.0  }
   0xf   :  { %v50_v2 = vsel %vm49_vm0, %v47_v0, 0.0  ;;  %v53_v3 = vsel %vm49_vm0, %v48_v1, 0.0  ;;  %v2182_v4 = vld [vmem:[#allocation2 + $0x18] sm:$0xff]  ;;  %1823 = vmatprep.subr.mxu1 %v2111_v5  ;;  %v2185_v6 = vld [vmem:[#allocation2 + $0x10] sm:$0xff]  ;;  %vm2112_vm1 = vmmov 0   ;;  %v2191_v7 = vld [vmem:[#allocation2 + $0x8] sm:$0xff] }
  0x10   :  { %51 = vadd.xlane.f32.xlu0 %v50_v2  ;;  %1831 = vmatprep.mubr.msk.f32.mxu1 %vm2112_vm1, %v2111_v5  ;;  %v2195_v8 = vld [vmem:[#allocation2] sm:$0xff]  ;;  %v98_v19 = vld [vmem:[%s2507_s3 + $0x18] sm:$0x3f]  ;;  %vm112_vm2 = vcmask 1045504   ;;  %v97_v20 = vld [vmem:[%s2507_s3 + $0x10] sm:$0xff]  ;;  %s2113_s28 = smov 64  }
  0x11   :  { %1824 = vmatpush3.msra.mxu1 %v2182_v4  ;;  %1812 = vmatprep.subr.msk.mxu0 %vm112_vm2, %v98_v19  ;;  %v96_v21 = vld [vmem:[%s2507_s3 + $0x8] sm:$0xff]  ;;  %v95_v22 = vld [vmem:[%s2507_s3] sm:$0xff]  ;;  %v2258_v58 = vld [vmem:[%s2511_s7 + $0x18] sm:$0xff]  ;;  %s2114_s17 = smov 96   ;;  %vm201_vm3 = vcmask 261120   ;;  %s2115_s19 = smov 16  }
  0x12   :  { %1825 = vmatprep.subr.mxu1 %v2111_v5  ;;  %1813 = vmatpush3.msk.msra.mxu0 %vm112_vm2, %v98_v19  ;;  %v1702_v23 = vld [vmem:[%s2510_s6] ss:$0 sm:$0xff]  ;;  %v2263_v59 = vld [vmem:[%s2511_s7 + $0x10] sm:$0xff]  ;;  %v2270_v60 = vld [vmem:[%s2511_s7 + $0x8] sm:$0xff]  ;;  %s2116_s0 = smov 48   ;;  %s2117_s5 = smov 80  }
  0x13   :  { %1826 = vmatpush3.msra.mxu1 %v2185_v6  ;;  %1814 = vmatprep.subr.mxu0 %v97_v20  ;;  %v1695_v35 = vld [vmem:[%s2505_s1] ss:$0 sm:$0xff]  ;;  %s2119_s20 = smov 112   ;;  %vm1666_vm4 = vcmask 130048   ;;  %vm1669_vm5 = vcmask 392192   ;;  %vm1671_vm6 = vcmask 523264  }
  0x14   :  { %54 = vadd.xlane.f32.xlu0 %v53_v3  ;;  %1827 = vmatprep.subr.mxu1 %v2111_v5  ;;  %v1696_v37 = vld [vmem:[%s2506_s2] ss:$0 sm:$0xff]  ;;  %vm1673_vm7 = vcmask 654336   ;;  %vm1675_vm8 = vcmask 785408   ;;  %s2120_s21 = smov [#allocation5]   ;;  %vm1677_vm9 = vcmask 916480  }
  0x15   :  { %1828 = vmatpush3.msra.mxu1 %v2191_v7  ;;  %1815 = vmatpush3.msra.mxu0 %v97_v20  ;;  %v1697_v44 = vld [vmem:[%s2508_s4] ss:$0 sm:$0xff]  ;;  %s1686_s22 = sshll.u32 %s2120_s21, 4  ;;  %s1687_s22 = int_to_ptr.vmem [resolvable:$true] %s1686_s22 }
  0x16   :  { %1829 = vmatprep.subr.mxu1 %v2111_v5  ;;  %1816 = vmatprep.subr.mxu0 %v96_v21  ;;  %v2277_v61 = vld [vmem:[%s2511_s7] sm:$0xff]  ;;  %s2084_s23 = scalar_lea.vmem %s1687_s22, 32  ;;  %p2089_p6 = scmp.lt.s32.totalorder %s1687_s22, %s1687_s22 }
  0x17   :  { %1830 = vmatpush3.msra.mxu1 %v2195_v8  ;;  %1817 = vmatpush3.msra.mxu0 %v96_v21  ;;  %p2085_p5 = scmp.ne.s32.totalorder %s1687_s22, %s2084_s23  ;;  %p2090_p7 = scmp.lt.s32.totalorder %s2084_s23, %s2084_s23 }
  0x18   :  { %1832 = vmatmul.mubr.f32.vlgmr.msra.gmra.mxu1 %v2111_v5  ;;  %1845 = vmatprep.subr.mxu1 %v2111_v5 }
  0x19   :  { %1846 = vmatpush3.msra.mxu1 %v2182_v4  ;;  %1853 = vmatprep.mubr.msk.f32.mxu1 %vm2112_vm1, %v2111_v5  ;;  %p2091_p8 = por %p2090_p7, %p2089_p6 }
  0x1a   :  { %1847 = vmatprep.subr.mxu1 %v2111_v5  ;;  %1818 = vmatprep.subr.mxu0 %v95_v22 }
  0x1b   :  { %1848 = vmatpush3.msra.mxu1 %v2185_v6  ;;  %1819 = vmatpush3.msra.mxu0 %v95_v22  ;;  %p2092_p9 = pnand %p2091_p8, %p2085_p5 }
  0x1c   :  { %1849 = vmatprep.subr.mxu1 %v2111_v5  ;;  %1834 = vmatprep.subr.mxu0 %v2111_v5 }
  0x1d   :  { %1850 = vmatpush3.msra.mxu1 %v2191_v7 }
  0x1e   :  { %1851 = vmatprep.subr.mxu1 %v2111_v5 }
  0x1f   :  { %1852 = vmatpush3.msra.mxu1 %v2195_v8 }
  0x20   :  { %1867 = vmatprep.subr.mxu1 %v2111_v5 }
  0x2a   :  { %287 = vrot.lane.b32.xlu0 %v1702_v23, %s2113_s28 }
  0x99   :  { %v52_v9 = vpop.xlane.xlu0 %51 }
  0x9a   :  { %v57_v10 = vmul.f32 0.033333335, %v52_v9 }
  0x9c   :  { %v59_v11 = vsub.f32 %v47_v0, %v57_v10 }
  0x9d   :  { %v55_v12 = vpop.xlane.xlu0 %54 }
  0x9e   :  { %v58_v13 = vmul.f32 0.033333335, %v55_v12  ;;  %v61_v14 = vmul.f32 %v59_v11, %v59_v11 }
  0xa0   :  { %v60_v15 = vsub.f32 %v48_v1, %v58_v13  ;;  %v63_v16 = vsel %vm49_vm0, %v61_v14, 0.0 }
  0xa1   :  { %64 = vadd.xlane.f32.xlu1 %v63_v16  ;;  %v2231_v32 = vpop.permute.xlu0 %287 }
  0xa2   :  { %v62_v17 = vmul.f32 %v60_v15, %v60_v15 }
  0xa4   :  { %v66_v18 = vsel %vm49_vm0, %v62_v17, 0.0 }
  0xa5   :  { %67 = vadd.xlane.f32.xlu1 %v66_v18 }
  0xd8   :  { %v271_v24 = vpop.f32.mrf.mxu1 }
  0xd9   :  { %v290_v33 = vadd.f32 %v2231_v32, %v271_v24 }
  0xda   :  { %v1833_v25 = vpop.f32.mrf.mxu1 }
  0xdb   :  { %292 = vrot.lane.b32.xlu1 %v290_v33, %s2113_s28 }
 0x12a   :  { %v65_v26 = vpop.xlane.xlu1 %64 }
 0x12b   :  { %v69_v27 = vmul.f32 0.033333335, %v65_v26 }
 0x12d   :  { %v71_v28 = vadd.f32 1e-05, %v69_v27 }
 0x12e   :  { %v68_v29 = vpop.xlane.xlu1 %67 }
 0x12f   :  { %2012 = vrsqrt.f32 %v71_v28  ;;  %v70_v30 = vmul.f32 0.033333335, %v68_v29 }
 0x131   :  { %v72_v31 = vadd.f32 1e-05, %v70_v30 }
 0x133   :  { %2014 = vrsqrt.f32 %v72_v31 }
 0x13c   :  { %v2013_v34 = vpop.eup %2012 }
 0x13d   :  { %v75_v36 = vmul.f32 %v2013_v34, %v59_v11 }
 0x13f   :  { %v84_v38 = vmul.f32 %v1695_v35, %v75_v36 }
 0x140   :  { %v2015_v39 = vpop.eup %2014 }
 0x141   :  { %v76_v40 = vmul.f32 %v2015_v39, %v60_v15  ;;  %v93_v41 = vadd.f32 %v1696_v37, %v84_v38 }
 0x143   :  { %v85_v42 = vmul.f32 %v1695_v35, %v76_v40  ;;  %1820 = vmatprep.mubr.msk.f32.mxu0 %vm49_vm0, %v93_v41 }
 0x145   :  { %v94_v43 = vadd.f32 %v1696_v37, %v85_v42 }
 0x147   :  { %1821 = vmatmul.mubr.msk.f32.vlgmr.msra.gmra.mxu0 %vm49_vm0, %v94_v43 }
 0x148   :  { %1842 = vmatprep.mubr.msk.f32.mxu0 %vm2112_vm1, %v2111_v5  ;;  %1835 = vmatpush3.msra.mxu0 %v2258_v58 }
 0x149   :  { %1836 = vmatprep.subr.mxu0 %v2111_v5 }
 0x14a   :  { %1837 = vmatpush3.msra.mxu0 %v2263_v59 }
 0x14b   :  { %1838 = vmatprep.subr.mxu0 %v2111_v5 }
 0x14c   :  { %1839 = vmatpush3.msra.mxu0 %v2270_v60 }
 0x14d   :  { %v293_v53 = vpop.permute.xlu1 %292  ;;  %1840 = vmatprep.subr.mxu0 %v2111_v5 }
 0x14e   :  { %1841 = vmatpush3.msra.mxu0 %v2277_v61 }
 0x14f   :  { %1856 = vmatprep.subr.mxu0 %v2111_v5 }
 0x207   :  { %v1822_v45 = vpop.f32.mrf.mxu0 }
 0x208   :  { %v2248_v46 = vadd.f32 %v1822_v45, %v1697_v44 }
 0x209   :  { %v182_v47 = vpop.f32.mrf.mxu0 }
 0x20a   :  { %v2250_v48 = vadd.f32 %v1697_v44, %v182_v47 }
 0x20c   :  { %v275_v49 = vadd.f32 %v271_v24, %v2250_v48 }
 0x20e   :  { %v1701_v50 = vmul.f32 -1.442695, %v275_v49 }
 0x210   :  { %2016 = vpow2.f32 %v1701_v50 }
 0x21d   :  { %v2017_v51 = vpop.eup %2016 }
 0x21e   :  { %v279_v52 = vadd.f32 1.0, %v2017_v51 }
 0x220   :  { %2018 = vrcp.f32 %v279_v52 }
 0x22d   :  { %v2019_v54 = vpop.eup %2018 }
 0x22e   :  { %v295_v55 = vmul.f32 %v2019_v54, %v293_v53  ;;  %v302_v63 = vsub.f32 1.0, %v2019_v54  ;;  %v308_v1 = vmul.f32 0.0, %v2019_v54 }
 0x230   :  { %297 = vrot.lane.b32.xlu1 %v295_v55, %s2113_s28 }
 0x2a2   :  { %v298_v56 = vpop.permute.xlu1 %297 }
 0x2a3   :  { %v300_v57 = vadd.f32 %v298_v56, %v2250_v48 }
 0x2a5   :  { %2020 = vtanh.f32 %v300_v57 }
 0x2b2   :  { %v2021_v62 = vpop.eup %2020 }
 0x2b3   :  { %304 = vrot.lane.b32.xlu1 %v2021_v62, %s2114_s17 }
 0x325   :  { %v305_v0 = vpop.permute.xlu1 %304 }
 0x326   :  { %v307_v2 = vmul.f32 %v305_v0, %v302_v63 }
 0x328   :  { %v309_v3 = vadd.f32 %v308_v1, %v307_v2 }
 0x32a   :  { %317 = vrot.lane.b32.xlu0 %v309_v3, %s2114_s17  ;;  %v490_v27 = vrot.slane %v309_v3, 6 }
 0x39c   :  { %v318_v9 = vpop.permute.xlu0 %317 }
 0x39d   :  { %1843 = vmatmul.mubr.msk.f32.vlgmr.msra.gmra.mxu0 %vm201_vm3, %v318_v9  ;;  %1854 = vmatmul.mubr.msk.f32.vlgmr.msra.gmra.mxu1 %vm201_vm3, %v318_v9 }
 0x39e   :  { %1857 = vmatpush3.msra.mxu0 %v2258_v58  ;;  %1868 = vmatpush3.msra.mxu1 %v2182_v4 }
 0x39f   :  { %1858 = vmatprep.subr.mxu0 %v2111_v5  ;;  %1869 = vmatprep.subr.mxu1 %v2111_v5 }
 0x3a0   :  { %1859 = vmatpush3.msra.mxu0 %v2263_v59  ;;  %1870 = vmatpush3.msra.mxu1 %v2185_v6 }
 0x3a1   :  { %1860 = vmatprep.subr.mxu0 %v2111_v5  ;;  %1871 = vmatprep.subr.mxu1 %v2111_v5 }
 0x3a2   :  { %1861 = vmatpush3.msra.mxu0 %v2270_v60  ;;  %1872 = vmatpush3.msra.mxu1 %v2191_v7 }
 0x3a3   :  { %1862 = vmatprep.subr.mxu0 %v2111_v5  ;;  %1873 = vmatprep.subr.mxu1 %v2111_v5 }
 0x3a4   :  { %1863 = vmatpush3.msra.mxu0 %v2277_v61  ;;  %1864 = vmatprep.mubr.msk.f32.mxu0 %vm2112_vm1, %v2111_v5 }
 0x3a5   :  { %1874 = vmatpush3.msra.mxu1 %v2195_v8  ;;  %1875 = vmatprep.mubr.msk.f32.mxu1 %vm2112_vm1, %v2111_v5 }
 0x3a6   :  { %1878 = vmatprep.subr.mxu0 %v2111_v5  ;;  %1889 = vmatprep.subr.mxu1 %v2111_v5 }
 0x45d   :  { %v2307_v10 = vpop.f32.mrf.mxu0  ;;  %v457_v11 = vpop.f32.mrf.mxu1 }
 0x45e   :  { %v471_v12 = vadd.f32 %v457_v11, %v2231_v32  ;;  %v462_v16 = vrot.slane %v457_v11, 6 }
 0x45f   :  { %v1844_v13 = vpop.f32.mrf.mxu0  ;;  %v1855_v14 = vpop.f32.mrf.mxu1 }
 0x460   :  { %v473_v15 = vrot.slane %v471_v12, 6  ;;  %v464_v17 = vadd.f32 %v462_v16, %v2250_v48 }
 0x462   :  { %474 = vrot.lane.b32.xlu1 %v473_v15, %s2113_s28  ;;  %v1706_v18 = vmul.f32 -1.442695, %v464_v17 }
 0x464   :  { %2022 = vpow2.f32 %v1706_v18 }
 0x471   :  { %v2023_v19 = vpop.eup %2022 }
 0x472   :  { %v468_v20 = vadd.f32 1.0, %v2023_v19 }
 0x474   :  { %2024 = vrcp.f32 %v468_v20 }
 0x481   :  { %v2025_v21 = vpop.eup %2024 }
 0x482   :  { %v484_v28 = vsub.f32 1.0, %v2025_v21  ;;  %v492_v31 = vmul.f32 %v2025_v21, %v490_v27 }
 0x4d4   :  { %v475_v22 = vpop.permute.xlu1 %474 }
 0x4d5   :  { %v477_v23 = vmul.f32 %v2025_v21, %v475_v22 }
 0x4d7   :  { %479 = vrot.lane.b32.xlu0 %v477_v23, %s2113_s28 }
 0x549   :  { %v480_v24 = vpop.permute.xlu0 %479 }
 0x54a   :  { %v482_v25 = vadd.f32 %v480_v24, %v2250_v48 }
 0x54c   :  { %2026 = vtanh.f32 %v482_v25 }
 0x559   :  { %v2027_v26 = vpop.eup %2026 }
 0x55a   :  { %486 = vrot.lane.b32.xlu1 %v2027_v26, %s2114_s17 }
 0x5cc   :  { %v487_v29 = vpop.permute.xlu1 %486 }
 0x5cd   :  { %v489_v30 = vmul.f32 %v487_v29, %v484_v28 }
 0x5cf   :  { %v493_v33 = vadd.f32 %v492_v31, %v489_v30 }
 0x5d1   :  { %v495_v34 = vrot.slane %v493_v33, 2  ;;  %v669_v55 = vrot.slane %v493_v33, 6 }
 0x5d3   :  { %496 = vrot.lane.b32.xlu0 %v495_v34, %s2114_s17 }
 0x645   :  { %v497_v35 = vpop.permute.xlu0 %496 }
 0x646   :  { %1865 = vmatmul.mubr.msk.f32.vlgmr.msra.gmra.mxu0 %vm201_vm3, %v497_v35  ;;  %1876 = vmatmul.mubr.msk.f32.vlgmr.msra.gmra.mxu1 %vm201_vm3, %v497_v35 }
 0x647   :  { %1879 = vmatpush3.msra.mxu0 %v2258_v58  ;;  %1890 = vmatpush3.msra.mxu1 %v2182_v4 }
 0x648   :  { %1880 = vmatprep.subr.mxu0 %v2111_v5  ;;  %1891 = vmatprep.subr.mxu1 %v2111_v5 }
 0x649   :  { %1881 = vmatpush3.msra.mxu0 %v2263_v59  ;;  %1892 = vmatpush3.msra.mxu1 %v2185_v6 }
 0x64a   :  { %1882 = vmatprep.subr.mxu0 %v2111_v5  ;;  %1893 = vmatprep.subr.mxu1 %v2111_v5 }
 0x64b   :  { %1883 = vmatpush3.msra.mxu0 %v2270_v60  ;;  %1894 = vmatpush3.msra.mxu1 %v2191_v7 }
 0x64c   :  { %1884 = vmatprep.subr.mxu0 %v2111_v5  ;;  %1895 = vmatprep.subr.mxu1 %v2111_v5 }
 0x64d   :  { %1896 = vmatpush3.msra.mxu1 %v2195_v8  ;;  %1897 = vmatprep.mubr.msk.f32.mxu1 %vm2112_vm1, %v2111_v5 }
 0x64e   :  { %1885 = vmatpush3.msra.mxu0 %v2277_v61  ;;  %1886 = vmatprep.mubr.msk.f32.mxu0 %vm2112_vm1, %v2111_v5 }
 0x64f   :  { %1900 = vmatprep.subr.mxu0 %v2111_v5  ;;  %1911 = vmatprep.subr.mxu1 %v2111_v5 }
 0x706   :  { %v2338_v36 = vpop.f32.mrf.mxu0  ;;  %v636_v37 = vpop.f32.mrf.mxu1 }
 0x707   :  { %v650_v38 = vadd.f32 %v636_v37, %v2231_v32  ;;  %v641_v42 = vrot.slane %v636_v37, 4 }
 0x708   :  { %v1866_v39 = vpop.f32.mrf.mxu0  ;;  %v1877_v40 = vpop.f32.mrf.mxu1 }
 0x709   :  { %v652_v41 = vrot.slane %v650_v38, 4  ;;  %v643_v43 = vadd.f32 %v641_v42, %v2250_v48 }
 0x70b   :  { %653 = vrot.lane.b32.xlu1 %v652_v41, %s2113_s28  ;;  %v1709_v44 = vmul.f32 -1.442695, %v643_v43 }
 0x70d   :  { %2028 = vpow2.f32 %v1709_v44 }
 0x71a   :  { %v2029_v45 = vpop.eup %2028 }
 0x71b   :  { %v647_v47 = vadd.f32 1.0, %v2029_v45 }
 0x71d   :  { %2030 = vrcp.f32 %v647_v47 }
 0x72a   :  { %v2031_v49 = vpop.eup %2030 }
 0x72b   :  { %v663_v56 = vsub.f32 1.0, %v2031_v49  ;;  %v671_v62 = vmul.f32 %v2031_v49, %v669_v55 }
 0x77d   :  { %v654_v50 = vpop.permute.xlu1 %653 }
 0x77e   :  { %v656_v51 = vmul.f32 %v2031_v49, %v654_v50 }
 0x780   :  { %658 = vrot.lane.b32.xlu0 %v656_v51, %s2113_s28 }
 0x7f2   :  { %v659_v52 = vpop.permute.xlu0 %658 }
 0x7f3   :  { %v661_v53 = vadd.f32 %v659_v52, %v2250_v48 }
 0x7f5   :  { %2032 = vtanh.f32 %v661_v53 }
 0x802   :  { %v2033_v54 = vpop.eup %2032 }
 0x803   :  { %665 = vrot.lane.b32.xlu1 %v2033_v54, %s2114_s17 }
 0x875   :  { %v666_v57 = vpop.permute.xlu1 %665 }
 0x876   :  { %v668_v63 = vmul.f32 %v666_v57, %v663_v56 }
 0x878   :  { %v672_v0 = vadd.f32 %v671_v62, %v668_v63 }
 0x87a   :  { %v674_v1 = vrot.slane %v672_v0, 4  ;;  %v848_v26 = vrot.slane %v672_v0, 6 }
 0x87c   :  { %675 = vrot.lane.b32.xlu0 %v674_v1, %s2114_s17 }
 0x8ee   :  { %v676_v2 = vpop.permute.xlu0 %675 }
 0x8ef   :  { %1887 = vmatmul.mubr.msk.f32.vlgmr.msra.gmra.mxu0 %vm201_vm3, %v676_v2  ;;  %1898 = vmatmul.mubr.msk.f32.vlgmr.msra.gmra.mxu1 %vm201_vm3, %v676_v2 }
 0x8f0   :  { %1901 = vmatpush3.msra.mxu0 %v2258_v58  ;;  %1912 = vmatpush3.msra.mxu1 %v2182_v4 }
 0x8f1   :  { %1902 = vmatprep.subr.mxu0 %v2111_v5  ;;  %1913 = vmatprep.subr.mxu1 %v2111_v5 }
 0x8f2   :  { %1903 = vmatpush3.msra.mxu0 %v2263_v59  ;;  %1914 = vmatpush3.msra.mxu1 %v2185_v6 }
 0x8f3   :  { %1904 = vmatprep.subr.mxu0 %v2111_v5  ;;  %1915 = vmatprep.subr.mxu1 %v2111_v5 }
 0x8f4   :  { %1905 = vmatpush3.msra.mxu0 %v2270_v60  ;;  %1916 = vmatpush3.msra.mxu1 %v2191_v7 }
 0x8f5   :  { %1906 = vmatprep.subr.mxu0 %v2111_v5  ;;  %1917 = vmatprep.subr.mxu1 %v2111_v5 }
 0x8f6   :  { %1918 = vmatpush3.msra.mxu1 %v2195_v8  ;;  %1919 = vmatprep.mubr.msk.f32.mxu1 %vm2112_vm1, %v2111_v5 }
 0x8f7   :  { %1907 = vmatpush3.msra.mxu0 %v2277_v61  ;;  %1908 = vmatprep.mubr.msk.f32.mxu0 %vm2112_vm1, %v2111_v5 }
 0x8f8   :  { %1922 = vmatprep.subr.mxu0 %v2111_v5  ;;  %1933 = vmatprep.subr.mxu1 %v2111_v5 }
 0x9af   :  { %v2369_v3 = vpop.f32.mrf.mxu0  ;;  %v815_v9 = vpop.f32.mrf.mxu1 }
 0x9b0   :  { %v829_v11 = vadd.f32 %v815_v9, %v2231_v32  ;;  %v820_v15 = vrot.slane %v815_v9, 2 }
 0x9b1   :  { %v1888_v12 = vpop.f32.mrf.mxu0  ;;  %v1899_v13 = vpop.f32.mrf.mxu1 }
 0x9b2   :  { %v831_v14 = vrot.slane %v829_v11, 2  ;;  %v822_v16 = vadd.f32 %v820_v15, %v2250_v48 }
 0x9b4   :  { %832 = vrot.lane.b32.xlu1 %v831_v14, %s2113_s28  ;;  %v1712_v17 = vmul.f32 -1.442695, %v822_v16 }
 0x9b6   :  { %2034 = vpow2.f32 %v1712_v17 }
 0x9c3   :  { %v2035_v18 = vpop.eup %2034 }
 0x9c4   :  { %v826_v19 = vadd.f32 1.0, %v2035_v18 }
 0x9c6   :  { %2036 = vrcp.f32 %v826_v19 }
 0x9d3   :  { %v2037_v20 = vpop.eup %2036 }
 0x9d4   :  { %v842_v27 = vsub.f32 1.0, %v2037_v20  ;;  %v850_v29 = vmul.f32 %v2037_v20, %v848_v26 }
 0xa26   :  { %v833_v21 = vpop.permute.xlu1 %832 }
 0xa27   :  { %v835_v22 = vmul.f32 %v2037_v20, %v833_v21 }
 0xa29   :  { %837 = vrot.lane.b32.xlu0 %v835_v22, %s2113_s28 }
 0xa9b   :  { %v838_v23 = vpop.permute.xlu0 %837 }
 0xa9c   :  { %v840_v24 = vadd.f32 %v838_v23, %v2250_v48 }
 0xa9e   :  { %2038 = vtanh.f32 %v840_v24 }
 0xaab   :  { %v2039_v25 = vpop.eup %2038 }
 0xaac   :  { %844 = vrot.lane.b32.xlu1 %v2039_v25, %s2114_s17 }
 0xb1e   :  { %v845_v28 = vpop.permute.xlu1 %844 }
 0xb1f   :  { %v847_v30 = vmul.f32 %v845_v28, %v842_v27 }
 0xb21   :  { %v851_v31 = vadd.f32 %v850_v29, %v847_v30 }
 0xb23   :  { %v853_v33 = vrot.slane %v851_v31, 6 }
 0xb25   :  { %854 = vrot.lane.b32.xlu0 %v853_v33, %s2114_s17 }
 0xb97   :  { %v855_v34 = vpop.permute.xlu0 %854 }
 0xb98   :  { %1909 = vmatmul.mubr.msk.f32.vlgmr.msra.gmra.mxu0 %vm201_vm3, %v855_v34  ;;  %1920 = vmatmul.mubr.msk.f32.vlgmr.msra.gmra.mxu1 %vm201_vm3, %v855_v34 }
 0xb99   :  { %1923 = vmatpush3.msra.mxu0 %v2258_v58  ;;  %1934 = vmatpush3.msra.mxu1 %v2182_v4 }
 0xb9a   :  { %1924 = vmatprep.subr.mxu0 %v2111_v5  ;;  %1935 = vmatprep.subr.mxu1 %v2111_v5 }
 0xb9b   :  { %1925 = vmatpush3.msra.mxu0 %v2263_v59  ;;  %1936 = vmatpush3.msra.mxu1 %v2185_v6 }
 0xb9c   :  { %1926 = vmatprep.subr.mxu0 %v2111_v5  ;;  %1937 = vmatprep.subr.mxu1 %v2111_v5 }
 0xb9d   :  { %1927 = vmatpush3.msra.mxu0 %v2270_v60  ;;  %1938 = vmatpush3.msra.mxu1 %v2191_v7 }
 0xb9e   :  { %1928 = vmatprep.subr.mxu0 %v2111_v5  ;;  %1939 = vmatprep.subr.mxu1 %v2111_v5 }
 0xb9f   :  { %1940 = vmatpush3.msra.mxu1 %v2195_v8  ;;  %1941 = vmatprep.mubr.msk.f32.mxu1 %vm2112_vm1, %v2111_v5 }
 0xba0   :  { %1929 = vmatpush3.msra.mxu0 %v2277_v61  ;;  %1930 = vmatprep.mubr.msk.f32.mxu0 %vm2112_vm1, %v2111_v5 }
 0xba1   :  { %1944 = vmatprep.subr.mxu0 %v2111_v5  ;;  %1955 = vmatprep.subr.mxu1 %v2111_v5 }
 0xc58   :  { %v2400_v48 = vpop.f32.mrf.mxu0  ;;  %v994_v35 = vpop.f32.mrf.mxu1 }
 0xc59   :  { %v1005_v37 = vadd.f32 %v994_v35, %v2231_v32  ;;  %v998_v40 = vadd.f32 %v994_v35, %v2248_v46 }
 0xc5a   :  { %v1910_v38 = vpop.f32.mrf.mxu0  ;;  %v1921_v39 = vpop.f32.mrf.mxu1 }
 0xc5b   :  { %1007 = vrot.lane.b32.xlu1 %v1005_v37, %s2113_s28  ;;  %v1715_v41 = vmul.f32 -1.442695, %v998_v40 }
 0xc5d   :  { %2040 = vpow2.f32 %v1715_v41 }
 0xc6a   :  { %v2041_v42 = vpop.eup %2040 }
 0xc6b   :  { %v1002_v43 = vadd.f32 1.0, %v2041_v42 }
 0xc6d   :  { %2042 = vrcp.f32 %v1002_v43 }
 0xc7a   :  { %v2043_v44 = vpop.eup %2042 }
 0xc7b   :  { %v1017_v52 = vsub.f32 1.0, %v2043_v44  ;;  %v1024_v54 = vmul.f32 %v2043_v44, %v853_v33 }
 0xccd   :  { %v1008_v45 = vpop.permute.xlu1 %1007 }
 0xcce   :  { %v1010_v47 = vmul.f32 %v2043_v44, %v1008_v45 }
 0xcd0   :  { %1012 = vrot.lane.b32.xlu0 %v1010_v47, %s2113_s28 }
 0xd42   :  { %v1013_v49 = vpop.permute.xlu0 %1012 }
 0xd43   :  { %v1015_v50 = vadd.f32 %v1013_v49, %v2248_v46 }
 0xd45   :  { %2044 = vtanh.f32 %v1015_v50 }
 0xd52   :  { %v2045_v51 = vpop.eup %2044 }
 0xd53   :  { %1019 = vrot.lane.b32.xlu1 %v2045_v51, %s2114_s17 }
 0xdc5   :  { %v1020_v53 = vpop.permute.xlu1 %1019 }
 0xdc6   :  { %v1022_v55 = vmul.f32 %v1020_v53, %v1017_v52 }
 0xdc8   :  { %v1025_v56 = vadd.f32 %v1024_v54, %v1022_v55 }
 0xdca   :  { %1027 = vrot.lane.b32.xlu0 %v1025_v56, %s2114_s17  ;;  %v1200_v22 = vrot.slane %v1025_v56, 6 }
 0xe3c   :  { %v1028_v57 = vpop.permute.xlu0 %1027 }
 0xe3d   :  { %1931 = vmatmul.mubr.msk.f32.vlgmr.msra.gmra.mxu0 %vm201_vm3, %v1028_v57  ;;  %1942 = vmatmul.mubr.msk.f32.vlgmr.msra.gmra.mxu1 %vm201_vm3, %v1028_v57 }
 0xe3e   :  { %1945 = vmatpush3.msra.mxu0 %v2258_v58  ;;  %1956 = vmatpush3.msra.mxu1 %v2182_v4 }
 0xe3f   :  { %1946 = vmatprep.subr.mxu0 %v2111_v5  ;;  %1957 = vmatprep.subr.mxu1 %v2111_v5 }
 0xe40   :  { %1947 = vmatpush3.msra.mxu0 %v2263_v59  ;;  %1958 = vmatpush3.msra.mxu1 %v2185_v6 }
 0xe41   :  { %1948 = vmatprep.subr.mxu0 %v2111_v5  ;;  %1959 = vmatprep.subr.mxu1 %v2111_v5 }
 0xe42   :  { %1949 = vmatpush3.msra.mxu0 %v2270_v60  ;;  %1960 = vmatpush3.msra.mxu1 %v2191_v7 }
 0xe43   :  { %1950 = vmatprep.subr.mxu0 %v2111_v5  ;;  %1961 = vmatprep.subr.mxu1 %v2111_v5 }
 0xe44   :  { %1962 = vmatpush3.msra.mxu1 %v2195_v8  ;;  %1963 = vmatprep.mubr.msk.f32.mxu1 %vm2112_vm1, %v2111_v5 }
 0xe45   :  { %1951 = vmatpush3.msra.mxu0 %v2277_v61  ;;  %1952 = vmatprep.mubr.msk.f32.mxu0 %vm2112_vm1, %v2111_v5 }
 0xe46   :  { %1966 = vmatprep.subr.mxu0 %v2111_v5  ;;  %1977 = vmatprep.subr.mxu1 %v2111_v5 }
 0xefd   :  { %v2431_v62 = vpop.f32.mrf.mxu0  ;;  %v1167_v63 = vpop.f32.mrf.mxu1 }
 0xefe   :  { %v1181_v0 = vadd.f32 %v1167_v63, %v2231_v32  ;;  %v1172_v11 = vrot.slane %v1167_v63, 6 }
 0xeff   :  { %v1932_v1 = vpop.f32.mrf.mxu0  ;;  %v1943_v2 = vpop.f32.mrf.mxu1 }
 0xf00   :  { %v1183_v9 = vrot.slane %v1181_v0, 6  ;;  %v1174_v12 = vadd.f32 %v1172_v11, %v2248_v46 }
 0xf02   :  { %1184 = vrot.lane.b32.xlu1 %v1183_v9, %s2113_s28  ;;  %v1718_v13 = vmul.f32 -1.442695, %v1174_v12 }
 0xf04   :  { %2046 = vpow2.f32 %v1718_v13 }
 0xf11   :  { %v2047_v14 = vpop.eup %2046 }
 0xf12   :  { %v1178_v15 = vadd.f32 1.0, %v2047_v14  ;;  %v1703_v14 = vld [vmem:[%s2512_s8] ss:$0 sm:$0xff]  ;;  %s2118_s8 = smov 32  }
 0xf14   :  { %2048 = vrcp.f32 %v1178_v15  ;;  %v567_v15 = vadd.f32 %v1703_v14, %v2338_v36  ;;  %v746_v36 = vadd.f32 %v1703_v14, %v2369_v3  ;;  %v388_v3 = vadd.f32 %v1703_v14, %v2307_v10 }
 0xf21   :  { %v2049_v16 = vpop.eup %2048 }
 0xf22   :  { %v1194_v23 = vsub.f32 1.0, %v2049_v16  ;;  %v1202_v25 = vmul.f32 %v2049_v16, %v1200_v22 }
 0xf74   :  { %v1185_v17 = vpop.permute.xlu1 %1184 }
 0xf75   :  { %v1187_v18 = vmul.f32 %v2049_v16, %v1185_v17  ;;  %v925_v16 = vadd.f32 %v1703_v14, %v2400_v48  ;;  %v1098_v48 = vadd.f32 %v1703_v14, %v2431_v62 }
 0xf77   :  { %1189 = vrot.lane.b32.xlu0 %v1187_v18, %s2113_s28 }
 0xfe9   :  { %v1190_v19 = vpop.permute.xlu0 %1189 }
 0xfea   :  { %v1192_v20 = vadd.f32 %v1190_v19, %v2248_v46 }
 0xfec   :  { %2050 = vtanh.f32 %v1192_v20 }
 0xff9   :  { %v2051_v21 = vpop.eup %2050 }
 0xffa   :  { %1196 = vrot.lane.b32.xlu1 %v2051_v21, %s2114_s17 }
0x106c   :  { %v1197_v24 = vpop.permute.xlu1 %1196 }
0x106d   :  { %v1199_v26 = vmul.f32 %v1197_v24, %v1194_v23 }
0x106f   :  { %v1203_v27 = vadd.f32 %v1202_v25, %v1199_v26 }
0x1071   :  { %v1205_v28 = vrot.slane %v1203_v27, 2  ;;  %v1379_v45 = vrot.slane %v1203_v27, 6 }
0x1073   :  { %1206 = vrot.lane.b32.xlu0 %v1205_v28, %s2114_s17 }
0x10e5   :  { %v1207_v29 = vpop.permute.xlu0 %1206 }
0x10e6   :  { %1953 = vmatmul.mubr.msk.f32.vlgmr.msra.gmra.mxu0 %vm201_vm3, %v1207_v29  ;;  %1964 = vmatmul.mubr.msk.f32.vlgmr.msra.gmra.mxu1 %vm201_vm3, %v1207_v29 }
0x10e7   :  { %1967 = vmatpush3.msra.mxu0 %v2258_v58  ;;  %1978 = vmatpush3.msra.mxu1 %v2182_v4 }
0x10e8   :  { %1968 = vmatprep.subr.mxu0 %v2111_v5  ;;  %1979 = vmatprep.subr.mxu1 %v2111_v5 }
0x10e9   :  { %1969 = vmatpush3.msra.mxu0 %v2263_v59  ;;  %1980 = vmatpush3.msra.mxu1 %v2185_v6 }
0x10ea   :  { %1970 = vmatprep.subr.mxu0 %v2111_v5  ;;  %1981 = vmatprep.subr.mxu1 %v2111_v5 }
0x10eb   :  { %1971 = vmatpush3.msra.mxu0 %v2270_v60  ;;  %1982 = vmatpush3.msra.mxu1 %v2191_v7 }
0x10ec   :  { %1972 = vmatprep.subr.mxu0 %v2111_v5  ;;  %1983 = vmatprep.subr.mxu1 %v2111_v5 }
0x10ed   :  { %1984 = vmatpush3.msra.mxu1 %v2195_v8  ;;  %1985 = vmatprep.mubr.msk.f32.mxu1 %vm2112_vm1, %v2111_v5 }
0x10ee   :  { %1973 = vmatpush3.msra.mxu0 %v2277_v61  ;;  %1974 = vmatprep.mubr.msk.f32.mxu0 %vm2112_vm1, %v2111_v5 }
0x10ef   :  { %1988 = vmatprep.subr.mxu0 %v2111_v5 }
0x11a6   :  { %v2461_v4 = vpop.f32.mrf.mxu0  ;;  %v1346_v6 = vpop.f32.mrf.mxu1 }
0x11a7   :  { %v1360_v7 = vadd.f32 %v1346_v6, %v2231_v32  ;;  %v1351_v8 = vrot.slane %v1346_v6, 4  ;;  %v1277_v17 = vadd.f32 %v1703_v14, %v2461_v4 }
0x11a8   :  { %v1954_v30 = vpop.f32.mrf.mxu0  ;;  %v1965_v31 = vpop.f32.mrf.mxu1 }
0x11a9   :  { %v1362_v33 = vrot.slane %v1360_v7, 4  ;;  %v1353_v34 = vadd.f32 %v1351_v8, %v2248_v46 }
0x11ab   :  { %1363 = vrot.lane.b32.xlu1 %v1362_v33, %s2113_s28  ;;  %v1721_v35 = vmul.f32 -1.442695, %v1353_v34 }
0x11ad   :  { %2052 = vpow2.f32 %v1721_v35 }
0x11ba   :  { %v2053_v37 = vpop.eup %2052 }
0x11bb   :  { %v1357_v38 = vadd.f32 1.0, %v2053_v37 }
0x11bd   :  { %2054 = vrcp.f32 %v1357_v38 }
0x11ca   :  { %v2055_v39 = vpop.eup %2054 }
0x11cb   :  { %v1373_v47 = vsub.f32 1.0, %v2055_v39  ;;  %v1381_v50 = vmul.f32 %v2055_v39, %v1379_v45 }
0x121d   :  { %v1364_v40 = vpop.permute.xlu1 %1363 }
0x121e   :  { %v1366_v41 = vmul.f32 %v2055_v39, %v1364_v40 }
0x1220   :  { %1368 = vrot.lane.b32.xlu0 %v1366_v41, %s2113_s28 }
0x1292   :  { %v1369_v42 = vpop.permute.xlu0 %1368 }
0x1293   :  { %v1371_v43 = vadd.f32 %v1369_v42, %v2248_v46 }
0x1295   :  { %2056 = vtanh.f32 %v1371_v43 }
0x12a2   :  { %v2057_v44 = vpop.eup %2056 }
0x12a3   :  { %1375 = vrot.lane.b32.xlu1 %v2057_v44, %s2114_s17 }
0x1315   :  { %v1376_v49 = vpop.permute.xlu1 %1375 }
0x1316   :  { %v1378_v51 = vmul.f32 %v1376_v49, %v1373_v47 }
0x1318   :  { %v1382_v52 = vadd.f32 %v1381_v50, %v1378_v51 }
0x131a   :  { %v1384_v53 = vrot.slane %v1382_v52, 4 }
0x131c   :  { %1385 = vrot.lane.b32.xlu0 %v1384_v53, %s2114_s17 }
0x138e   :  { %v1386_v54 = vpop.permute.xlu0 %1385 }
0x138f   :  { %1975 = vmatmul.mubr.msk.f32.vlgmr.msra.gmra.mxu0 %vm201_vm3, %v1386_v54  ;;  %1986 = vmatmul.mubr.msk.f32.vlgmr.msra.gmra.mxu1 %vm201_vm3, %v1386_v54 }
0x1390   :  { %1989 = vmatpush3.msra.mxu0 %v2258_v58  ;;  %1996 = vmatprep.mubr.msk.f32.mxu0 %vm2112_vm1, %v2111_v5 }
0x1391   :  { %1990 = vmatprep.subr.mxu0 %v2111_v5 }
0x1392   :  { %1991 = vmatpush3.msra.mxu0 %v2263_v59 }
0x1393   :  { %1992 = vmatprep.subr.mxu0 %v2111_v5 }
0x1394   :  { %1993 = vmatpush3.msra.mxu0 %v2270_v60 }
0x1395   :  { %1994 = vmatprep.subr.mxu0 %v2111_v5 }
0x1396   :  { %1995 = vmatpush3.msra.mxu0 %v2277_v61 }
0x144f   :  { %v1455_v55 = vpop.f32.mrf.mxu0  ;;  %v1525_v56 = vpop.f32.mrf.mxu1 }
0x1450   :  { %v1539_v57 = vadd.f32 %v1525_v56, %v2231_v32  ;;  %v1530_v1 = vrot.slane %v1525_v56, 2  ;;  %v1456_v24 = vadd.f32 %v1703_v14, %v1455_v55 }
0x1451   :  { %v1976_v58 = vpop.f32.mrf.mxu0  ;;  %v1987_v63 = vpop.f32.mrf.mxu1 }
0x1452   :  { %v1541_v0 = vrot.slane %v1539_v57, 2  ;;  %v1532_v59 = vadd.f32 %v1530_v1, %v2248_v46 }
0x1454   :  { %1542 = vrot.lane.b32.xlu1 %v1541_v0, %s2113_s28  ;;  %v1724_v2 = vmul.f32 -1.442695, %v1532_v59 }
0x1456   :  { %2058 = vpow2.f32 %v1724_v2 }
0x1463   :  { %v2059_v9 = vpop.eup %2058 }
0x1464   :  { %v1536_v60 = vadd.f32 1.0, %v2059_v9 }
0x1466   :  { %2060 = vrcp.f32 %v1536_v60 }
0x1473   :  { %v2061_v5 = vpop.eup %2060 }
0x1474   :  { %v1552_v18 = vsub.f32 1.0, %v2061_v5 }
0x14c6   :  { %v1543_v11 = vpop.permute.xlu1 %1542 }
0x14c7   :  { %v1545_v61 = vmul.f32 %v2061_v5, %v1543_v11 }
0x14c9   :  { %1547 = vrot.lane.b32.xlu0 %v1545_v61, %s2113_s28 }
0x153b   :  { %v1548_v12 = vpop.permute.xlu0 %1547 }
0x153c   :  { %v1550_v32 = vadd.f32 %v1548_v12, %v2248_v46  ;;  %v1558_v46 = vrot.slane %v1382_v52, 6 }
0x153e   :  { %2062 = vtanh.f32 %v1550_v32  ;;  %v1560_v20 = vmul.f32 %v2061_v5, %v1558_v46 }
0x154b   :  { %v2063_v13 = vpop.eup %2062 }
0x154c   :  { %1554 = vrot.lane.b32.xlu1 %v2063_v13, %s2114_s17 }
0x1550   :  { %1639 = vrot.lane.b32.xlu1 %v567_v15, %s2115_s19 }
0x1554   :  { %1647 = vrot.lane.b32.xlu1 %v925_v16, %s2116_s0 }
0x1558   :  { %1655 = vrot.lane.b32.xlu1 %v1277_v17, %s2117_s5 }
0x15be   :  { %v1555_v19 = vpop.permute.xlu1 %1554 }
0x15bf   :  { %v1557_v21 = vmul.f32 %v1555_v19, %v1552_v18 }
0x15c1   :  { %v1561_v22 = vadd.f32 %v1560_v20, %v1557_v21 }
0x15c2   :  { %v1640_v29 = vpop.permute.xlu1 %1639 }
0x15c3   :  { %v1563_v23 = vrot.slane %v1561_v22, 6  ;;  %v1667_v62 = vsel %vm1666_vm4, %v388_v3, %v1640_v29 }
0x15c5   :  { %1564 = vrot.lane.b32.xlu0 %v1563_v23, %s2114_s17 }
0x15c6   :  { %v1648_v6 = vpop.permute.xlu1 %1647 }
0x15c9   :  { %1643 = vrot.lane.b32.xlu0 %v746_v36, %s2118_s8 }
0x15ca   :  { %v1656_v33 = vpop.permute.xlu1 %1655 }
0x15cd   :  { %1651 = vrot.lane.b32.xlu0 %v1098_v48, %s2113_s28 }
0x15d1   :  { %1659 = vrot.lane.b32.xlu0 %v1456_v24, %s2114_s17 }
0x1637   :  { %v1565_v25 = vpop.permute.xlu0 %1564 }
0x1638   :  { %1997 = vmatmul.mubr.msk.f32.vlgmr.msra.gmra.mxu0 %vm201_vm3, %v1565_v25 }
0x163b   :  { %v1644_v4 = vpop.permute.xlu0 %1643 }
0x163c   :  { %v1668_v30 = vsel %vm201_vm3, %v1667_v62, %v1644_v4 }
0x163d   :  { %v1670_v31 = vsel %vm1669_vm5, %v1668_v30, %v1648_v6 }
0x163f   :  { %v1652_v7 = vpop.permute.xlu0 %1651 }
0x1640   :  { %v1672_v8 = vsel %vm1671_vm6, %v1670_v31, %v1652_v7 }
0x1641   :  { %v1674_v35 = vsel %vm1673_vm7, %v1672_v8, %v1656_v33 }
0x1643   :  { %v1660_v34 = vpop.permute.xlu0 %1659 }
0x1644   :  { %v1676_v37 = vsel %vm1675_vm8, %v1674_v35, %v1660_v34 }
0x16f8   :  { %v1634_v26 = vpop.f32.mrf.mxu0 }
0x16f9   :  { %v1635_v27 = vadd.f32 %v1703_v14, %v1634_v26 }
0x16fa   :  { %v1998_v28 = vpop.f32.mrf.mxu0 }
0x16fb   :  { %1663 = vrot.lane.b32.xlu1 %v1635_v27, %s2119_s20 }
0x176d   :  { %v1664_v38 = vpop.permute.xlu1 %1663 }
0x176e   :  { %v1678_v10 = vsel %vm1677_vm9, %v1676_v37, %v1664_v38 }
0x176f   :  { %1679 = vst [vmem:[#allocation5] sm:$0x3] %v1678_v10 }
0x1770   :  { %2095 = shalt.err (!%p2092_p9)
}
0x1771   :  { %1689 = dma.vmem_to_hbm [thread:$0]  %s1687_s22, 32, %s2513_s9, [#allocation4]  }
0x1772   :  { %2106 = dma.done.wait [#allocation4], 32  }
0x1773   :  { %2107 = vsyncadd [#allocation4], 4294967264 }
0x1774   :  { %1693 = vsyncpa [#allocation3], 1 }
0x1775   :  { %1694 = vsyncpa [#allocation4], 1 }

</bundles_post_ra>
